<compile_context>
chip_gen: v6e
topology: v6e:2x2x1
jax: 0.10.0
libtpu: 0.0.40
codegen_flags: <defaults>
</compile_context>

<pallas_src>
import functools

import jax
import jax.numpy as jnp
from jax import lax
from jax.experimental import pallas as pl
from jax.experimental.pallas import tpu as pltpu


def _round_up(a, m):
    return ((a + m - 1) // m) * m


def _largest_divisor_tile(padded, cap, granule):
    """Largest multiple of `granule` that divides `padded` and is <= cap."""
    best = granule
    t = granule
    limit = min(cap, padded)
    while t <= limit:
        if padded % t == 0:
            best = t
        t += granule
    return best


def _vmem_info():
    """Returns (physical VMEM bytes, double-buffered working-set budget)."""
    try:
        info = pltpu.get_tpu_info()
        phys = int(getattr(info, "vmem_capacity_bytes", 64 << 20))
    except Exception:  # non-TPU / interpret fallback
        phys = 64 << 20
    # Stay well under physical VMEM: ~26 MiB on v7x (64 MiB), capped at
    # 48 MiB on v5e/v6e (128 MiB physical).
    budget = max(8 << 20, min(phys // 2 - (6 << 20), 48 << 20))
    return phys, budget


def _linear_kernel_f32(x_ref, w_ref, b_ref, o_ref, *, precision):
    # x_ref: [tm, tk], w_ref: [tk, tn] (pre-transposed W), b_ref: [1, tn],
    # o_ref: [tm, tn] f32 — resident across k, used directly as accumulator.
    @pl.when(pl.program_id(2) == 0)
    def _():
        o_ref[...] = jnp.broadcast_to(b_ref[...].astype(jnp.float32), o_ref.shape)

    o_ref[...] += jnp.dot(
        x_ref[...], w_ref[...],
        preferred_element_type=jnp.float32, precision=precision)


def _linear_kernel_acc(x_ref, w_ref, b_ref, o_ref, acc_ref, *, precision):
    # Narrow output dtype: accumulate in f32 scratch, cast at finalize.
    k = pl.program_id(2)

    @pl.when(k == 0)
    def _():
        acc_ref[...] = jnp.zeros_like(acc_ref)

    acc_ref[...] += jnp.dot(
        x_ref[...], w_ref[...],
        preferred_element_type=jnp.float32, precision=precision)

    @pl.when(k == pl.num_programs(2) - 1)
    def _():
        o_ref[...] = (acc_ref[...] + b_ref[...].astype(jnp.float32)).astype(o_ref.dtype)


class PallasLinear:
    """Pallas-TPU equivalent of torch.nn.Linear with PyTorch-layout params."""

    def __init__(self, weight, bias, *, tm_max=512, tn_max=512, tk_max=1024,
                 precision=lax.Precision.HIGHEST):
        # precision=HIGHEST matches PyTorch f32 nn.Linear numerics; drop to
        # lax.Precision.DEFAULT for maximum MXU throughput on large shapes.
        D_out, D_in = weight.shape
        assert bias.shape == (D_out,)
        self.D_in, self.D_out = D_in, D_out
        self.tm_max, self.tn_max, self.tk_max = tm_max, tn_max, tk_max
        self.precision = precision

        # Originals kept for the tiny-shape fast path.
        self.weight = weight
        self.bias = bias

        # One-time relayout of the static, reused parameters:
        #   W^T padded to lane-aligned [Kp, Np]; bias padded to [1, Np].
        self.Kp = _round_up(D_in, 128)
        self.Np = _round_up(D_out, 128)
        wt = weight.T  # [D_in, D_out]
        if (self.Kp, self.Np) != (D_in, D_out):
            wt = jnp.pad(wt, ((0, self.Kp - D_in), (0, self.Np - D_out)))
        self.w_t = wt
        b = bias if self.Np == D_out else jnp.pad(bias, (0, self.Np - D_out))
        self.b = b.reshape(1, self.Np)

    def __call__(self, x, *, force_pallas=False):
        B, D_in = x.shape
        assert D_in == self.D_in
        # Tiny-problem fast path: launch/pad/slice overhead would dominate.
        if not force_pallas and 2 * B * D_in * self.D_out < 10_000_000:
            return x @ self.weight.T + self.bias
        return self._pallas_forward(x)

    def _pallas_forward(self, x):
        B, D_in = x.shape
        Kp, Np = self.Kp, self.Np
        in_itemsize = jnp.dtype(x.dtype).itemsize
        w_itemsize = jnp.dtype(self.w_t.dtype).itemsize
        out_dtype = x.dtype
        out_itemsize = jnp.dtype(out_dtype).itemsize
        use_acc = jnp.dtype(out_dtype) != jnp.dtype(jnp.float32)

        # dtype-aware sublane granule: 8 rows (f32), 16 (bf16), 32 (int8).
        m_granule = max(8, 32 // in_itemsize)

        phys_vmem, budget = _vmem_info()

        # ---------------- tile selection ----------------
        Mp = _round_up(B, m_granule)
        if Mp <= self.tm_max:
            tm = Mp                      # whole batch in one tile: W read once
        else:
            tm = _largest_divisor_tile(Mp, self.tm_max, m_granule)
            if tm < min(256, self.tm_max):   # poor divisors: pad M instead
                tm = self.tm_max
                Mp = _round_up(Mp, tm)

        tn = _largest_divisor_tile(Np, self.tn_max, 128)
        tk = _largest_divisor_tile(Kp, self.tk_max, 128)

        # Keep >=2 blocks on a parallel axis so v7x's 2 TensorCores both work.
        if Mp // tm == 1 and Np // tn == 1 and tn > 128:
            tn = _largest_divisor_tile(Np, tn // 2, 128)

        def working_set(tm_, tn_, tk_):
            ws = 2 * tm_ * tk_ * in_itemsize        # x  (double-buffered)
            ws += 2 * tk_ * tn_ * w_itemsize        # W^T
            ws += 2 * tn_ * w_itemsize              # bias
            ws += 2 * tm_ * tn_ * out_itemsize      # out
            if use_acc:
                ws += tm_ * tn_ * 4
            return ws

        # Shrink (tk, then tn, then tm) until the working set fits the budget.
        while working_set(tm, tn, tk) > budget and tk > 128:
            tk = _largest_divisor_tile(Kp, tk // 2, 128)
        while working_set(tm, tn, tk) > budget and tn > 128:
            tn = _largest_divisor_tile(Np, tn // 2, 128)
        while working_set(tm, tn, tk) > budget and tm > m_granule:
            tm = _largest_divisor_tile(Mp, max(tm // 2, m_granule), m_granule)

        grid = (Mp // tm, Np // tn, Kp // tk)

        # Per-call activation padding only when B / D_in are unaligned.
        xp = x
        if (Mp, Kp) != (B, D_in):
            xp = jnp.pad(x, ((0, Mp - B), (0, Kp - D_in)))

        # Cost estimate accounting for x / W re-reads under this tiling.
        cost = pl.CostEstimate(
            flops=2 * Mp * Kp * Np,
            transcendentals=0,
            bytes_accessed=(
                in_itemsize * Mp * Kp * grid[1]      # x read once per N tile
                + w_itemsize * Kp * Np * grid[0]     # W read once per M tile
                + w_itemsize * Np * grid[0]          # bias
                + out_itemsize * Mp * Np             # output written once
            ),
        )

        if use_acc:
            kernel = functools.partial(_linear_kernel_acc, precision=self.precision)
            scratch = (pltpu.VMEM((tm, tn), jnp.float32),)
        else:
            kernel = functools.partial(_linear_kernel_f32, precision=self.precision)
            scratch = ()

        vmem_limit = int(min(
            phys_vmem - (4 << 20),
            max(32 << 20, working_set(tm, tn, tk) + (8 << 20)),
        ))

        out_p = pl.pallas_call(
            kernel,
            out_shape=jax.ShapeDtypeStruct((Mp, Np), out_dtype),
            grid_spec=pltpu.PrefetchScalarGridSpec(
                num_scalar_prefetch=0,
                grid=grid,
                in_specs=[
                    pl.BlockSpec((tm, tk), lambda i, j, k: (i, k)),   # x tile
                    # W^T tile; on v5e add pipeline_mode=pl.Buffered(3) if the
                    # trace shows DMA-exposed stalls on the weight stream.
                    pl.BlockSpec((tk, tn), lambda i, j, k: (k, j)),
                    pl.BlockSpec((1, tn), lambda i, j, k: (0, j)),    # bias
                ],
                out_specs=pl.BlockSpec((tm, tn), lambda i, j, k: (i, j)),
                scratch_shapes=scratch,
            ),
            compiler_params=pltpu.CompilerParams(
                dimension_semantics=("parallel", "parallel", "arbitrary"),
                vmem_limit_bytes=vmem_limit,
            ),
            cost_estimate=cost,
        )(xp, self.w_t, self.b)

        if (Mp, Np) != (B, self.D_out):
            out_p = out_p[:B, :self.D_out]
        return out_p


if __name__ == "__main__":
    key = jax.random.PRNGKey(0)
    k1, k2, k3, k4, k5, k6 = jax.random.split(key, 6)

    # --- Case 1: the original training-script shape (tiny), forced through
    # --- the Pallas kernel to exercise it end-to-end.
    batch, input_dim, output_dim = 8, 4, 4
    bound = 1.0 / (input_dim ** 0.5)   # PyTorch nn.Linear default init range
    x = jax.random.normal(k1, (batch, input_dim), dtype=jnp.float32)
    weight = jax.random.uniform(k2, (output_dim, input_dim), jnp.float32, -bound, bound)
    bias = jax.random.uniform(k3, (output_dim,), jnp.float32, -bound, bound)

    model = PallasLinear(weight, bias)
    out = jax.block_until_ready(model(x, force_pallas=True))
    ref = jnp.dot(x, weight.T, precision=lax.Precision.HIGHEST) + bias
    assert out.shape == (batch, output_dim)
    assert jnp.allclose(out, ref, atol=1e-5, rtol=1e-5)

    # Auto path on the tiny shape takes the jnp.dot fast path; check it too.
    out_fast = jax.block_until_ready(model(x))
    assert jnp.allclose(out_fast, ref, atol=1e-4, rtol=1e-4)

    # --- Case 2: modest 128-aligned shape with small tile caps so a full
    # --- (2, 2, 2) grid, multi-step K accumulation, and the zero-padding
    # --- (no per-call jnp.pad) path are all exercised.
    batch2, input_dim2, output_dim2 = 128, 256, 256
    bound2 = 1.0 / (input_dim2 ** 0.5)
    x2 = jax.random.normal(k4, (batch2, input_dim2), dtype=jnp.float32)
    weight2 = jax.random.uniform(k5, (output_dim2, input_dim2), jnp.float32, -bound2, bound2)
    bias2 = jax.random.uniform(k6, (output_dim2,), jnp.float32, -bound2, bound2)

    model2 = PallasLinear(weight2, bias2, tm_max=64, tn_max=128, tk_max=128)
    out2 = jax.block_until_ready(model2(x2))
    ref2 = jnp.dot(x2, weight2.T, precision=lax.Precision.HIGHEST) + bias2
    assert out2.shape == (batch2, output_dim2)
    assert jnp.allclose(out2, ref2, atol=1e-4, rtol=1e-4)

    print("KERNEL_OK")
</pallas_src>

<mosaic_0001>
module attributes {stable_mosaic.version = 11 : i64} {
  func.func @_linear_kernel_f32(%arg0: i32, %arg1: i32, %arg2: i32, %arg3: memref<8x128xf32, #tpu.memory_space<vmem>>, %arg4: memref<128x128xf32, #tpu.memory_space<vmem>>, %arg5: memref<1x128xf32, #tpu.memory_space<vmem>>, %arg6: memref<8x128xf32, #tpu.memory_space<vmem>>) attributes {dimension_semantics = [#tpu.dimension_semantics<parallel>, #tpu.dimension_semantics<parallel>, #tpu.dimension_semantics<arbitrary>], iteration_bounds = array<i64: 1, 1, 1>, scalar_prefetch = 0 : i64, scratch_operands = 0 : i64, tpu.core_type = #tpu.core_type<tc>, window_params = [{transform_indices = @transform_0, window_bounds = array<i64: 8, 128>}, {transform_indices = @transform_1, window_bounds = array<i64: 128, 128>}, {transform_indices = @transform_2, window_bounds = array<i64: 1, 128>}, {transform_indices = @transform_3, window_bounds = array<i64: 8, 128>}]} {
    %c0_i32 = arith.constant 0 : i32
    %0 = arith.cmpi eq, %arg2, %c0_i32 : i32
    %1 = arith.extui %0 : i1 to i32
    %c0_i32_0 = arith.constant 0 : i32
    %2 = arith.cmpi ne, %1, %c0_i32_0 : i32
    scf.if %2 {
      %c0_8 = arith.constant 0 : index
      %c0_9 = arith.constant 0 : index
      %9 = vector.load %arg5[%c0_8, %c0_9] : memref<1x128xf32, #tpu.memory_space<vmem>>, vector<1x128xf32>
      %10 = vector.shape_cast %9 : vector<1x128xf32> to vector<1x128xf32>
      %11 = vector.broadcast %10 : vector<1x128xf32> to vector<8x128xf32>
      %c0_10 = arith.constant 0 : index
      %c0_11 = arith.constant 0 : index
      %12 = vector.load %arg6[%c0_10, %c0_11] : memref<8x128xf32, #tpu.memory_space<vmem>>, vector<8x128xf32>
      tpu.vector_store %arg6[%c0_10, %c0_11], %11 {strides = array<i32>} : memref<8x128xf32, #tpu.memory_space<vmem>>, vector<8x128xf32>,
    } else {
    }
    %c0 = arith.constant 0 : index
    %c0_1 = arith.constant 0 : index
    %3 = vector.load %arg6[%c0, %c0_1] : memref<8x128xf32, #tpu.memory_space<vmem>>, vector<8x128xf32>
    %c0_2 = arith.constant 0 : index
    %c0_3 = arith.constant 0 : index
    %4 = vector.load %arg3[%c0_2, %c0_3] : memref<8x128xf32, #tpu.memory_space<vmem>>, vector<8x128xf32>
    %c0_4 = arith.constant 0 : index
    %c0_5 = arith.constant 0 : index
    %5 = vector.load %arg4[%c0_4, %c0_5] : memref<128x128xf32, #tpu.memory_space<vmem>>, vector<128x128xf32>
    %cst = arith.constant dense<0.000000e+00> : vector<8x128xf32>
    %6 = tpu.matmul %4, %5, %cst {dimension_numbers = #tpu.dot_dimension_numbers<[1], [0], [0], [1], [0, 0, 1, 1], [], []>, precision = #tpu.contract_precision<fp32>} : vector<8x128xf32>, vector<128x128xf32>, vector<8x128xf32> -> vector<8x128xf32>
    %7 = arith.addf %3, %6 : vector<8x128xf32>
    %c0_6 = arith.constant 0 : index
    %c0_7 = arith.constant 0 : index
    %8 = vector.load %arg6[%c0_6, %c0_7] : memref<8x128xf32, #tpu.memory_space<vmem>>, vector<8x128xf32>
    tpu.vector_store %arg6[%c0_6, %c0_7], %7 {strides = array<i32>} : memref<8x128xf32, #tpu.memory_space<vmem>>, vector<8x128xf32>,
    return
  }
  func.func @transform_0(%arg0: i32, %arg1: i32, %arg2: i32) -> (i32, i32) {
    %c0_i32 = arith.constant 0 : i32
    return %arg0, %arg2 : i32, i32
  }
  func.func @transform_1(%arg0: i32, %arg1: i32, %arg2: i32) -> (i32, i32) {
    %c0_i32 = arith.constant 0 : i32
    return %arg2, %arg1 : i32, i32
  }
  func.func @transform_2(%arg0: i32, %arg1: i32, %arg2: i32) -> (i32, i32) {
    %c0_i32 = arith.constant 0 : i32
    %c0_i32_0 = arith.constant 0 : i32
    return %c0_i32, %arg1 : i32, i32
  }
  func.func @transform_3(%arg0: i32, %arg1: i32, %arg2: i32) -> (i32, i32) {
    %c0_i32 = arith.constant 0 : i32
    return %arg0, %arg1 : i32, i32
  }
}

</mosaic_0001>

<bundles_post_ra>
// kernel: tpu_custom_call.1
= control target key start
LH: loop header
LB: loop body
LE: loop exit
PB: predicated region body
PF: predicated region fallthrough
CT: control target
= control target key end

     0   :  { %8 = vsyncpa [#allocation3], 0  ;;  %s1518_s0 = inlined_call_operand.hbm [shape: f32[8,128], index: 0, kind: input, shape index: {}]   ;;  %s1519_s1 = inlined_call_operand.hbm [shape: f32[128,128], index: 1, kind: input, shape index: {}]   ;;  %s1520_s2 = inlined_call_operand.vmem [shape: f32[1,128], index: 2, kind: input, shape index: {}]   ;;  %s1521_s3 = inlined_call_operand.hbm [shape: f32[8,128], index: 3, kind: output, shape index: {}]  }
   0x1   :  { %9 = vsyncpa [#allocation6], 0 }
   0x2   :  { %10 = vsyncpa [#allocation4], 0  ;;  %s1116_s12 = smov [#allocation2]   ;;  %s1117_s14 = smov [#allocation5]  }
   0x3   :  { %s17_s13 = sshll.u32 %s1116_s12, 4  ;;  %s26_s15 = sshll.u32 %s1117_s14, 4  ;;  %s18_s13 = int_to_ptr.vmem [resolvable:$true] %s17_s13  ;;  %s27_s15 = int_to_ptr.vmem [resolvable:$true] %s26_s15 }
   0x4   :  { %s1058_s16 = scalar_lea.vmem %s18_s13, 128  ;;  %p1063_p1 = scmp.lt.s32.totalorder %s18_s13, %s18_s13 }
   0x5   :  { %p1059_p0 = scmp.ne.s32.totalorder %s18_s13, %s1058_s16  ;;  %p1064_p2 = scmp.lt.s32.totalorder %s1058_s16, %s1058_s16 }
   0x7   :  { %p1065_p3 = por %p1064_p2, %p1063_p1 }
   0x9   :  { %p1066_p4 = pnand %p1065_p3, %p1059_p0 }
   0xb   :  { %1069 = shalt.err (!%p1066_p4)
}
   0xc   :  { %20 = dma.hbm_to_vmem [thread:$0]  %s1518_s0, 128, %s18_s13, [#allocation3]  }
   0xd   :  { %s1078_s19 = scalar_lea.vmem %s27_s15, 2048  ;;  %p1083_p6 = scmp.lt.s32.totalorder %s27_s15, %s27_s15 }
   0xe   :  { %p1079_p5 = scmp.ne.s32.totalorder %s27_s15, %s1078_s19  ;;  %p1084_p7 = scmp.lt.s32.totalorder %s1078_s19, %s1078_s19 }
  0x10   :  { %p1085_p8 = por %p1084_p7, %p1083_p6 }
  0x12   :  { %p1086_p9 = pnand %p1085_p8, %p1079_p5 }
  0x14   :  { %1089 = shalt.err (!%p1086_p9)
}
  0x15   :  { %s1118_s20 = smov 128   ;;  %s1119_s21 = smov 8  }
  0x16   :  { %32 = dma.hbm_to_vmem [thread:$0]  %s1519_s1, 2048, %s27_s15, [#allocation6], %s1118_s20, %s1118_s20, %s1119_s21  }
  0x17   :  { %1110 = dma.done.wait [#allocation3], 128  }
  0x18   :  { %1111 = vsyncadd [#allocation3], 4294967168 }
  0x19   :  { %1112 = dma.done.wait [#allocation6], 2048  }
  0x1a   :  { %1113 = vsyncadd [#allocation6], 4294965248  ;;  %v1120_v0 = vmov 0.0   ;;  %vm1121_vm0 = vmmov 0   ;;  %v70_v1 = vld [vmem:[#allocation5 + $0x78] sm:$0xff]  ;;  %v69_v2 = vld [vmem:[#allocation5 + $0x70] sm:$0xff] }
  0x1b   :  { %833 = vmatprep.subr.mxu0 %v1120_v0  ;;  %868 = vmatprep.subr.mxu1 %v1120_v0  ;;  %v68_v3 = vld [vmem:[#allocation5 + $0x68] sm:$0xff]  ;;  %v1155_v4 = vand.u32 4294901760, %v70_v1  ;;  %v1157_v5 = vand.u32 4294901760, %v69_v2  ;;  %v67_v7 = vld [vmem:[#allocation5 + $0x60] sm:$0xff]  ;;  %v66_v8 = vld [vmem:[#allocation5 + $0x58] sm:$0xff]  ;;  %s1122_s24 = smov [#allocation7]  }
  0x1c   :  { %865 = vmatprep.mubr.msk.f32.mxu0 %vm1121_vm0, %v1120_v0  ;;  %900 = vmatprep.mubr.msk.f32.mxu1 %vm1121_vm0, %v1120_v0  ;;  %v1159_v6 = vand.u32 4294901760, %v68_v3  ;;  %v65_v9 = vld [vmem:[#allocation5 + $0x50] sm:$0xff]  ;;  %v1161_v10 = vand.u32 4294901760, %v67_v7  ;;  %v1163_v11 = vand.u32 4294901760, %v66_v8  ;;  %v64_v13 = vld [vmem:[#allocation5 + $0x48] sm:$0xff]  ;;  %v63_v14 = vld [vmem:[#allocation5 + $0x40] sm:$0xff] }
  0x1d   :  { %v1165_v12 = vand.u32 4294901760, %v65_v9  ;;  %834 = vmatpush3.msra.mxu0 %v1155_v4  ;;  %v1169_v15 = vsub.f32 %v70_v1, %v1155_v4  ;;  %v1172_v16 = vsub.f32 %v69_v2, %v1157_v5  ;;  %v1174_v17 = vand.u32 4294901760, %v64_v13  ;;  %v62_v19 = vld [vmem:[#allocation5 + $0x38] sm:$0xff]  ;;  %v61_v26 = vld [vmem:[#allocation5 + $0x30] sm:$0xff]  ;;  %v60_v36 = vld [vmem:[#allocation5 + $0x28] sm:$0xff]  ;;  %s720_s25 = sshll.u32 %s1122_s24, 4  ;;  %s721_s25 = int_to_ptr.vmem [resolvable:$true] %s720_s25 }
  0x1e   :  { %v1177_v18 = vsub.f32 %v68_v3, %v1159_v6  ;;  %835 = vmatprep.subr.mxu0 %v1120_v0  ;;  %v1181_v20 = vsub.f32 %v67_v7, %v1161_v10  ;;  %v1184_v21 = vsub.f32 %v66_v8, %v1163_v11  ;;  %v1190_v25 = vand.u32 4294901760, %v63_v14  ;;  %v59_v41 = vld [vmem:[#allocation5 + $0x20] sm:$0xff]  ;;  %v58_v49 = vld [vmem:[#allocation5 + $0x18] sm:$0xff]  ;;  %v57_v54 = vld [vmem:[#allocation5 + $0x10] sm:$0xff]  ;;  %s1090_s26 = scalar_lea.vmem %s721_s25, 128  ;;  %p1095_p11 = scmp.lt.s32.totalorder %s721_s25, %s721_s25 }
  0x1f   :  { %836 = vmatpush3.msra.mxu0 %v1157_v5  ;;  %v165_v22 = vand.u32 4294901760, %v1169_v15  ;;  %v172_v23 = vand.u32 4294901760, %v1172_v16  ;;  %v1194_v28 = vand.u32 4294901760, %v62_v19  ;;  %v1198_v30 = vsub.f32 %v65_v9, %v1165_v12  ;;  %v54_v50 = vld [vmem:[#allocation2] sm:$0xff]  ;;  %v56_v60 = vld [vmem:[#allocation5 + $0x8] sm:$0xff]  ;;  %v55_v7 = vld [vmem:[#allocation5] sm:$0xff]  ;;  %p1091_p10 = scmp.ne.s32.totalorder %s721_s25, %s1090_s26  ;;  %p1096_p12 = scmp.lt.s32.totalorder %s1090_s26, %s1090_s26 }
  0x20   :  { %v179_v24 = vand.u32 4294901760, %v1177_v18  ;;  %837 = vmatprep.subr.mxu0 %v1120_v0  ;;  %v186_v27 = vand.u32 4294901760, %v1181_v20  ;;  %v193_v29 = vand.u32 4294901760, %v1184_v21  ;;  %v1211_v34 = vsub.f32 %v64_v13, %v1174_v17 }
  0x21   :  { %838 = vmatpush3.msra.mxu0 %v1159_v6  ;;  %v166_v31 = vsub.f32 %v1169_v15, %v165_v22  ;;  %v173_v32 = vsub.f32 %v1172_v16, %v172_v23  ;;  %v1214_v35 = vand.u32 4294901760, %v61_v26  ;;  %v200_v40 = vand.u32 4294901760, %v1198_v30  ;;  %p1097_p13 = por %p1096_p12, %p1095_p11 }
  0x22   :  { %v180_v33 = vsub.f32 %v1177_v18, %v179_v24  ;;  %839 = vmatprep.subr.mxu0 %v1120_v0  ;;  %v187_v39 = vsub.f32 %v1181_v20, %v186_v27  ;;  %v194_v42 = vsub.f32 %v1184_v21, %v193_v29  ;;  %v1226_v43 = vsub.f32 %v63_v14, %v1190_v25 }
  0x23   :  { %840 = vmatpush3.msra.mxu0 %v1161_v10  ;;  %v167_v37 = vand.u32 4294901760, %v166_v31  ;;  %v174_v38 = vand.u32 4294901760, %v173_v32  ;;  %v1229_v45 = vand.u32 4294901760, %v60_v36  ;;  %v207_v46 = vand.u32 4294901760, %v1211_v34  ;;  %p1098_p0 = pnand %p1097_p13, %p1091_p10 }
  0x24   :  { %841 = vmatprep.subr.mxu0 %v1120_v0  ;;  %v181_v44 = vand.u32 4294901760, %v180_v33  ;;  %v1233_v47 = vsub.f32 %v62_v19, %v1194_v28  ;;  %v1237_v48 = vand.u32 4294901760, %v59_v41  ;;  %v188_v51 = vand.u32 4294901760, %v187_v39 }
  0x25   :  { %842 = vmatpush3.msra.mxu0 %v1163_v11  ;;  %869 = vmatpush3.msra.mxu1 %v167_v37  ;;  %v201_v52 = vsub.f32 %v1198_v30, %v200_v40  ;;  %v214_v53 = vand.u32 4294901760, %v1226_v43  ;;  %v1245_v55 = vsub.f32 %v61_v26, %v1214_v35  ;;  %v195_v56 = vand.u32 4294901760, %v194_v42 }
  0x26   :  { %843 = vmatprep.subr.mxu0 %v1120_v0  ;;  %870 = vmatprep.subr.mxu1 %v1120_v0  ;;  %v221_v57 = vand.u32 4294901760, %v1233_v47  ;;  %v208_v58 = vsub.f32 %v1211_v34, %v207_v46  ;;  %v1254_v59 = vand.u32 4294901760, %v58_v49  ;;  %v1257_v61 = vsub.f32 %v60_v36, %v1229_v45 }
  0x27   :  { %844 = vmatpush3.msra.mxu0 %v1165_v12  ;;  %871 = vmatpush3.msra.mxu1 %v174_v38  ;;  %v1259_v62 = vand.u32 4294901760, %v54_v50  ;;  %v1263_v63 = vand.u32 4294901760, %v57_v54  ;;  %v202_v1 = vand.u32 4294901760, %v201_v52  ;;  %v215_v2 = vsub.f32 %v1226_v43, %v214_v53 }
  0x28   :  { %845 = vmatprep.subr.mxu0 %v1120_v0  ;;  %872 = vmatprep.subr.mxu1 %v1120_v0  ;;  %v228_v3 = vand.u32 4294901760, %v1245_v55  ;;  %v1271_v8 = vsub.f32 %v59_v41, %v1237_v48  ;;  %v222_v9 = vsub.f32 %v1233_v47, %v221_v57  ;;  %v1278_v13 = vand.u32 4294901760, %v56_v60 }
  0x29   :  { %846 = vmatpush3.msra.mxu0 %v1174_v17  ;;  %873 = vmatpush3.msra.mxu1 %v181_v44  ;;  %v209_v14 = vand.u32 4294901760, %v208_v58  ;;  %v235_v19 = vand.u32 4294901760, %v1257_v61  ;;  %v1283_v26 = vsub.f32 %v54_v50, %v1259_v62  ;;  %v1286_v31 = vsub.f32 %v58_v49, %v1254_v59 }
  0x2a   :  { %847 = vmatprep.subr.mxu0 %v1120_v0  ;;  %874 = vmatprep.subr.mxu1 %v1120_v0  ;;  %v1290_v32 = vand.u32 4294901760, %v55_v7  ;;  %v216_v33 = vand.u32 4294901760, %v215_v2  ;;  %v229_v36 = vsub.f32 %v1245_v55, %v228_v3  ;;  %v242_v37 = vand.u32 4294901760, %v1271_v8 }
  0x2b   :  { %848 = vmatpush3.msra.mxu0 %v1190_v25  ;;  %875 = vmatpush3.msra.mxu1 %v188_v51  ;;  %v1298_v38 = vsub.f32 %v57_v54, %v1263_v63  ;;  %v223_v39 = vand.u32 4294901760, %v222_v9  ;;  %v236_v41 = vsub.f32 %v1257_v61, %v235_v19  ;;  %v154_v42 = vand.u32 4294901760, %v1283_v26 }
  0x2c   :  { %849 = vmatprep.subr.mxu0 %v1120_v0  ;;  %876 = vmatprep.subr.mxu1 %v1120_v0  ;;  %v249_v44 = vand.u32 4294901760, %v1286_v31  ;;  %v1309_v49 = vsub.f32 %v56_v60, %v1278_v13  ;;  %v230_v50 = vand.u32 4294901760, %v229_v36  ;;  %v243_v51 = vsub.f32 %v1271_v8, %v242_v37 }
  0x2d   :  { %850 = vmatpush3.msra.mxu0 %v1194_v28  ;;  %877 = vmatpush3.msra.mxu1 %v195_v56  ;;  %v256_v52 = vand.u32 4294901760, %v1298_v38  ;;  %v1319_v54 = vsub.f32 %v55_v7, %v1290_v32  ;;  %v237_v56 = vand.u32 4294901760, %v236_v41  ;;  %v155_v58 = vsub.f32 %v1283_v26, %v154_v42 }
  0x2e   :  { %851 = vmatprep.subr.mxu0 %v1120_v0  ;;  %878 = vmatprep.subr.mxu1 %v1120_v0  ;;  %v250_v60 = vsub.f32 %v1286_v31, %v249_v44  ;;  %v244_v2 = vand.u32 4294901760, %v243_v51 }
  0x2f   :  { %852 = vmatpush3.msra.mxu0 %v1214_v35  ;;  %879 = vmatpush3.msra.mxu1 %v202_v1  ;;  %v263_v1 = vand.u32 4294901760, %v1309_v49  ;;  %v257_v7 = vsub.f32 %v1298_v38, %v256_v52  ;;  %v270_v9 = vand.u32 4294901760, %v1319_v54 }
  0x30   :  { %853 = vmatprep.subr.mxu0 %v1120_v0  ;;  %880 = vmatprep.subr.mxu1 %v1120_v0 }
  0x31   :  { %854 = vmatpush3.msra.mxu0 %v1229_v45  ;;  %881 = vmatpush3.msra.mxu1 %v209_v14  ;;  %v156_v14 = vand.u32 4294901760, %v155_v58  ;;  %v264_v36 = vsub.f32 %v1309_v49, %v263_v1  ;;  %v271_v41 = vsub.f32 %v1319_v54, %v270_v9 }
  0x32   :  { %855 = vmatprep.subr.mxu0 %v1120_v0  ;;  %882 = vmatprep.subr.mxu1 %v1120_v0 }
  0x33   :  { %856 = vmatpush3.msra.mxu0 %v1237_v48  ;;  %883 = vmatpush3.msra.mxu1 %v216_v33  ;;  %v251_v33 = vand.u32 4294901760, %v250_v60  ;;  %v272_v51 = vand.u32 4294901760, %v271_v41 }
  0x34   :  { %857 = vmatprep.subr.mxu0 %v1120_v0  ;;  %884 = vmatprep.subr.mxu1 %v1120_v0 }
  0x35   :  { %858 = vmatpush3.msra.mxu0 %v1254_v59  ;;  %885 = vmatpush3.msra.mxu1 %v223_v39  ;;  %v258_v39 = vand.u32 4294901760, %v257_v7 }
  0x36   :  { %859 = vmatprep.subr.mxu0 %v1120_v0  ;;  %886 = vmatprep.subr.mxu1 %v1120_v0 }
  0x37   :  { %860 = vmatpush3.msra.mxu0 %v1263_v63  ;;  %887 = vmatpush3.msra.mxu1 %v230_v50  ;;  %v265_v50 = vand.u32 4294901760, %v264_v36 }
  0x38   :  { %861 = vmatprep.subr.mxu0 %v1120_v0  ;;  %888 = vmatprep.subr.mxu1 %v1120_v0 }
  0x39   :  { %862 = vmatpush3.msra.mxu0 %v1278_v13  ;;  %889 = vmatpush3.msra.mxu1 %v237_v56 }
  0x3a   :  { %863 = vmatprep.subr.mxu0 %v1120_v0  ;;  %890 = vmatprep.subr.mxu1 %v1120_v0 }
  0x3b   :  { %864 = vmatpush3.msra.mxu0 %v1290_v32  ;;  %891 = vmatpush3.msra.mxu1 %v244_v2 }
  0x3c   :  { %892 = vmatprep.subr.mxu1 %v1120_v0  ;;  %903 = vmatprep.subr.mxu0 %v1120_v0 }
  0x3d   :  { %866 = vmatmul.mubr.f32.vlgmr.msra.gmra.mxu0 %v156_v14  ;;  %893 = vmatpush3.msra.mxu1 %v251_v33 }
  0x3e   :  { %904 = vmatpush3.msra.mxu0 %v1169_v15  ;;  %894 = vmatprep.subr.mxu1 %v1120_v0 }
  0x3f   :  { %905 = vmatprep.subr.mxu0 %v1120_v0  ;;  %895 = vmatpush3.msra.mxu1 %v258_v39 }
  0x40   :  { %906 = vmatpush3.msra.mxu0 %v1172_v16  ;;  %896 = vmatprep.subr.mxu1 %v1120_v0 }
  0x41   :  { %907 = vmatprep.subr.mxu0 %v1120_v0  ;;  %897 = vmatpush3.msra.mxu1 %v265_v50 }
  0x42   :  { %908 = vmatpush3.msra.mxu0 %v1177_v18  ;;  %898 = vmatprep.subr.mxu1 %v1120_v0 }
  0x43   :  { %909 = vmatprep.subr.mxu0 %v1120_v0  ;;  %899 = vmatpush3.msra.mxu1 %v272_v51 }
  0x44   :  { %910 = vmatpush3.msra.mxu0 %v1181_v20  ;;  %901 = vmatmul.mubr.f32.vlgmr.msra.gmra.mxu1 %v1259_v62 }
  0x45   :  { %911 = vmatprep.subr.mxu0 %v1120_v0  ;;  %938 = vmatprep.subr.mxu1 %v1120_v0 }
  0x46   :  { %912 = vmatpush3.msra.mxu0 %v1184_v21  ;;  %939 = vmatpush3.msra.mxu1 %v1155_v4 }
  0x47   :  { %913 = vmatprep.subr.mxu0 %v1120_v0  ;;  %940 = vmatprep.subr.mxu1 %v1120_v0 }
  0x48   :  { %914 = vmatpush3.msra.mxu0 %v1198_v30  ;;  %941 = vmatpush3.msra.mxu1 %v1157_v5 }
  0x49   :  { %915 = vmatprep.subr.mxu0 %v1120_v0  ;;  %942 = vmatprep.subr.mxu1 %v1120_v0 }
  0x4a   :  { %916 = vmatpush3.msra.mxu0 %v1211_v34  ;;  %943 = vmatpush3.msra.mxu1 %v1159_v6 }
  0x4b   :  { %917 = vmatprep.subr.mxu0 %v1120_v0  ;;  %944 = vmatprep.subr.mxu1 %v1120_v0 }
  0x4c   :  { %918 = vmatpush3.msra.mxu0 %v1226_v43  ;;  %945 = vmatpush3.msra.mxu1 %v1161_v10 }
  0x4d   :  { %919 = vmatprep.subr.mxu0 %v1120_v0  ;;  %946 = vmatprep.subr.mxu1 %v1120_v0 }
  0x4e   :  { %920 = vmatpush3.msra.mxu0 %v1233_v47  ;;  %947 = vmatpush3.msra.mxu1 %v1163_v11 }
  0x4f   :  { %921 = vmatprep.subr.mxu0 %v1120_v0  ;;  %948 = vmatprep.subr.mxu1 %v1120_v0 }
  0x50   :  { %922 = vmatpush3.msra.mxu0 %v1245_v55  ;;  %949 = vmatpush3.msra.mxu1 %v1165_v12 }
  0x51   :  { %923 = vmatprep.subr.mxu0 %v1120_v0  ;;  %950 = vmatprep.subr.mxu1 %v1120_v0 }
  0x52   :  { %924 = vmatpush3.msra.mxu0 %v1257_v61  ;;  %951 = vmatpush3.msra.mxu1 %v1174_v17 }
  0x53   :  { %925 = vmatprep.subr.mxu0 %v1120_v0  ;;  %952 = vmatprep.subr.mxu1 %v1120_v0 }
  0x54   :  { %926 = vmatpush3.msra.mxu0 %v1271_v8  ;;  %953 = vmatpush3.msra.mxu1 %v1190_v25 }
  0x55   :  { %927 = vmatprep.subr.mxu0 %v1120_v0  ;;  %954 = vmatprep.subr.mxu1 %v1120_v0 }
  0x56   :  { %928 = vmatpush3.msra.mxu0 %v1286_v31  ;;  %955 = vmatpush3.msra.mxu1 %v1194_v28 }
  0x57   :  { %929 = vmatprep.subr.mxu0 %v1120_v0  ;;  %956 = vmatprep.subr.mxu1 %v1120_v0 }
  0x58   :  { %930 = vmatpush3.msra.mxu0 %v1298_v38  ;;  %957 = vmatpush3.msra.mxu1 %v1214_v35 }
  0x59   :  { %931 = vmatprep.subr.mxu0 %v1120_v0  ;;  %958 = vmatprep.subr.mxu1 %v1120_v0 }
  0x5a   :  { %932 = vmatpush3.msra.mxu0 %v1309_v49  ;;  %959 = vmatpush3.msra.mxu1 %v1229_v45 }
  0x5b   :  { %933 = vmatprep.subr.mxu0 %v1120_v0  ;;  %960 = vmatprep.subr.mxu1 %v1120_v0 }
  0x5c   :  { %934 = vmatpush3.msra.mxu0 %v1319_v54  ;;  %935 = vmatprep.mubr.msk.f32.mxu0 %vm1121_vm0, %v1120_v0 }
  0x5d   :  { %961 = vmatpush3.msra.mxu1 %v1237_v48  ;;  %936 = vmatmul.mubr.f32.vlgmr.msra.gmra.mxu0 %v1283_v26 }
  0x5e   :  { %962 = vmatprep.subr.mxu1 %v1120_v0  ;;  %973 = vmatprep.subr.mxu0 %v1120_v0 }
  0x5f   :  { %963 = vmatpush3.msra.mxu1 %v1254_v59  ;;  %974 = vmatpush3.msra.mxu0 %v165_v22 }
  0x60   :  { %964 = vmatprep.subr.mxu1 %v1120_v0  ;;  %975 = vmatprep.subr.mxu0 %v1120_v0 }
  0x61   :  { %965 = vmatpush3.msra.mxu1 %v1263_v63  ;;  %976 = vmatpush3.msra.mxu0 %v172_v23 }
  0x62   :  { %966 = vmatprep.subr.mxu1 %v1120_v0  ;;  %977 = vmatprep.subr.mxu0 %v1120_v0 }
  0x63   :  { %967 = vmatpush3.msra.mxu1 %v1278_v13  ;;  %978 = vmatpush3.msra.mxu0 %v179_v24 }
  0x64   :  { %968 = vmatprep.subr.mxu1 %v1120_v0  ;;  %979 = vmatprep.subr.mxu0 %v1120_v0 }
  0x65   :  { %969 = vmatpush3.msra.mxu1 %v1290_v32  ;;  %970 = vmatprep.mubr.msk.f32.mxu1 %vm1121_vm0, %v1120_v0 }
  0x66   :  { %980 = vmatpush3.msra.mxu0 %v186_v27  ;;  %971 = vmatmul.mubr.f32.vlgmr.msra.gmra.mxu1 %v154_v42 }
  0x67   :  { %981 = vmatprep.subr.mxu0 %v1120_v0  ;;  %1008 = vmatprep.subr.mxu1 %v1120_v0 }
  0x68   :  { %982 = vmatpush3.msra.mxu0 %v193_v29  ;;  %1009 = vmatpush3.msra.mxu1 %v1155_v4 }
  0x69   :  { %983 = vmatprep.subr.mxu0 %v1120_v0  ;;  %1010 = vmatprep.subr.mxu1 %v1120_v0 }
  0x6a   :  { %984 = vmatpush3.msra.mxu0 %v200_v40  ;;  %1011 = vmatpush3.msra.mxu1 %v1157_v5 }
  0x6b   :  { %985 = vmatprep.subr.mxu0 %v1120_v0  ;;  %1012 = vmatprep.subr.mxu1 %v1120_v0 }
  0x6c   :  { %986 = vmatpush3.msra.mxu0 %v207_v46  ;;  %1013 = vmatpush3.msra.mxu1 %v1159_v6 }
  0x6d   :  { %987 = vmatprep.subr.mxu0 %v1120_v0  ;;  %1014 = vmatprep.subr.mxu1 %v1120_v0 }
  0x6e   :  { %988 = vmatpush3.msra.mxu0 %v214_v53  ;;  %1015 = vmatpush3.msra.mxu1 %v1161_v10 }
  0x6f   :  { %989 = vmatprep.subr.mxu0 %v1120_v0  ;;  %1016 = vmatprep.subr.mxu1 %v1120_v0 }
  0x70   :  { %990 = vmatpush3.msra.mxu0 %v221_v57  ;;  %1017 = vmatpush3.msra.mxu1 %v1163_v11 }
  0x71   :  { %991 = vmatprep.subr.mxu0 %v1120_v0  ;;  %1018 = vmatprep.subr.mxu1 %v1120_v0 }
  0x72   :  { %992 = vmatpush3.msra.mxu0 %v228_v3  ;;  %1019 = vmatpush3.msra.mxu1 %v1165_v12 }
  0x73   :  { %993 = vmatprep.subr.mxu0 %v1120_v0  ;;  %1020 = vmatprep.subr.mxu1 %v1120_v0 }
  0x74   :  { %994 = vmatpush3.msra.mxu0 %v235_v19  ;;  %1021 = vmatpush3.msra.mxu1 %v1174_v17 }
  0x75   :  { %995 = vmatprep.subr.mxu0 %v1120_v0  ;;  %1022 = vmatprep.subr.mxu1 %v1120_v0 }
  0x76   :  { %996 = vmatpush3.msra.mxu0 %v242_v37  ;;  %1023 = vmatpush3.msra.mxu1 %v1190_v25 }
  0x77   :  { %997 = vmatprep.subr.mxu0 %v1120_v0  ;;  %1024 = vmatprep.subr.mxu1 %v1120_v0 }
  0x78   :  { %998 = vmatpush3.msra.mxu0 %v249_v44  ;;  %1025 = vmatpush3.msra.mxu1 %v1194_v28 }
  0x79   :  { %999 = vmatprep.subr.mxu0 %v1120_v0  ;;  %1026 = vmatprep.subr.mxu1 %v1120_v0 }
  0x7a   :  { %1000 = vmatpush3.msra.mxu0 %v256_v52  ;;  %1027 = vmatpush3.msra.mxu1 %v1214_v35 }
  0x7b   :  { %1001 = vmatprep.subr.mxu0 %v1120_v0  ;;  %1028 = vmatprep.subr.mxu1 %v1120_v0 }
  0x7c   :  { %1002 = vmatpush3.msra.mxu0 %v263_v1  ;;  %1029 = vmatpush3.msra.mxu1 %v1229_v45 }
  0x7d   :  { %1003 = vmatprep.subr.mxu0 %v1120_v0  ;;  %1030 = vmatprep.subr.mxu1 %v1120_v0 }
  0x7e   :  { %1004 = vmatpush3.msra.mxu0 %v270_v9  ;;  %1005 = vmatprep.mubr.msk.f32.mxu0 %vm1121_vm0, %v1120_v0 }
  0x7f   :  { %1031 = vmatpush3.msra.mxu1 %v1237_v48  ;;  %1006 = vmatmul.mubr.f32.vlgmr.msra.gmra.mxu0 %v1259_v62 }
  0x80   :  { %1032 = vmatprep.subr.mxu1 %v1120_v0  ;;  %1040 = vmatprep.mubr.msk.f32.mxu1 %vm1121_vm0, %v1120_v0 }
  0x81   :  { %1033 = vmatpush3.msra.mxu1 %v1254_v59 }
  0x82   :  { %1034 = vmatprep.subr.mxu1 %v1120_v0 }
  0x83   :  { %1035 = vmatpush3.msra.mxu1 %v1263_v63 }
  0x84   :  { %1036 = vmatprep.subr.mxu1 %v1120_v0 }
  0x85   :  { %1037 = vmatpush3.msra.mxu1 %v1278_v13 }
  0x86   :  { %1038 = vmatprep.subr.mxu1 %v1120_v0  ;;  %v730_v0 = vld [vmem:[%s1520_s2] ss:$0 sm:$0xff] }
  0x87   :  { %1039 = vmatpush3.msra.mxu1 %v1290_v32 }
  0x88   :  { %1041 = vmatmul.mubr.f32.vlgmr.msra.gmra.mxu1 %v1259_v62 }
  0xfd   :  { %v158_v4 = vpop.f32.mrf.mxu0 }
  0xff   :  { %v867_v5 = vpop.f32.mrf.mxu0 }
 0x104   :  { %v309_v6 = vpop.f32.mrf.mxu1 }
 0x105   :  { %v310_v18 = vadd.f32 %v309_v6, %v158_v4 }
 0x106   :  { %v902_v10 = vpop.f32.mrf.mxu1 }
 0x11d   :  { %v413_v11 = vpop.f32.mrf.mxu0 }
 0x11e   :  { %v414_v21 = vadd.f32 %v413_v11, %v310_v18 }
 0x11f   :  { %v937_v12 = vpop.f32.mrf.mxu0 }
 0x126   :  { %v502_v15 = vpop.f32.mrf.mxu1 }
 0x127   :  { %v503_v22 = vadd.f32 %v502_v15, %v414_v21 }
 0x128   :  { %v972_v16 = vpop.f32.mrf.mxu1 }
 0x13f   :  { %v621_v17 = vpop.f32.mrf.mxu0 }
 0x140   :  { %v622_v23 = vadd.f32 %v621_v17, %v503_v22 }
 0x141   :  { %v1007_v20 = vpop.f32.mrf.mxu0 }
 0x148   :  { %v708_v24 = vpop.f32.mrf.mxu1 }
 0x149   :  { %v709_v25 = vadd.f32 %v708_v24, %v622_v23 }
 0x14a   :  { %v1042_v27 = vpop.f32.mrf.mxu1 }
 0x14b   :  { %v712_v28 = vadd.f32 %v730_v0, %v709_v25 }
 0x14d   :  { %713 = vst [vmem:[#allocation7] sm:$0xff] %v712_v28 }
 0x14e   :  { %1101 = shalt.err (!%p1098_p0)
}
 0x14f   :  { %723 = dma.vmem_to_hbm [thread:$0]  %s721_s25, 128, %s1521_s3, [#allocation4]  }
 0x150   :  { %1114 = dma.done.wait [#allocation4], 128  }
 0x151   :  { %1115 = vsyncadd [#allocation4], 4294967168 }
 0x152   :  { %727 = vsyncpa [#allocation3], 1 }
 0x153   :  { %728 = vsyncpa [#allocation6], 1 }
 0x154   :  { %729 = vsyncpa [#allocation4], 1 }

</bundles_post_ra>
